<compile_context>
chip_gen: v7x
topology: tpu7x:2x2x1
jax: 0.10.0
libtpu: 0.0.40
codegen_flags: <defaults>
</compile_context>

<pallas_src>
import jax
import jax.numpy as jnp
from jax import lax
from jax.experimental import pallas as pl
from jax.experimental.pallas import tpu as pltpu


def _round_up(x, m):
    return ((x + m - 1) // m) * m


def ffn_kernel(x_ref, w1_ref, w3_ref, w2_ref, o_ref, acc_ref):
    """One (token-tile, hidden-tile) step of the fused SwiGLU FFN.

    x_ref  : (tm, dim)       activations (native dtype, straight to the MXU)
    w1_ref : (th, dim)       PyTorch nn.Linear layout (out_features, in_features)
    w3_ref : (th, dim)
    w2_ref : (dim, th)
    o_ref  : (tm, dim)       output tile (resident across the hidden axis)
    acc_ref: (tm, dim) f32   VMEM accumulator
    """
    h = pl.program_id(1)

    @pl.when(h == 0)
    def _():
        acc_ref[...] = jnp.zeros_like(acc_ref)

    x = x_ref[...]

    # x @ W^T without materializing any transpose: contract the last dim of
    # both operands.  Operands stay in native dtype (bf16 -> f32 MXU path when
    # weights are bf16); only the accumulation type is f32.
    dnums = (((1,), (1,)), ((), ()))
    h1 = lax.dot_general(x, w1_ref[...], dnums,
                         preferred_element_type=jnp.float32)   # (tm, th)
    h3 = lax.dot_general(x, w3_ref[...], dnums,
                         preferred_element_type=jnp.float32)   # (tm, th)

    # SiLU gate in f32 (sigmoid lowers to the EUP; keep f32 math for v5e too).
    gated = (h1 * jax.nn.sigmoid(h1)) * h3

    # Partial down-projection for this hidden chunk: gated @ w2_tile^T.
    acc_ref[...] += lax.dot_general(
        gated.astype(w2_ref.dtype), w2_ref[...], dnums,
        preferred_element_type=jnp.float32)

    @pl.when(h == pl.num_programs(1) - 1)
    def _():
        o_ref[...] = acc_ref[...].astype(o_ref.dtype)


def _pick_hidden_tile(hidden, dim, tm, itemsize, budget=48 * 1024 * 1024):
    """Largest hidden tile whose double-buffered VMEM footprint fits the budget
    (budget chosen to be safe on v7x's 64 MiB VMEM as well as v5e/v6e)."""
    for th in (1024, 512, 256, 128):
        if th <= hidden and hidden % th == 0:
            w_bytes = 3 * th * dim * itemsize          # w1 + w3 + w2 tiles
            io_bytes = 2 * tm * dim * itemsize         # x tile + out tile
            need = 2 * (w_bytes + io_bytes) + tm * dim * 4   # 2x-buffered + f32 acc
            if need <= budget:
                return th
    return hidden  # small hidden: full-extent block is allowed by BlockSpec rules


def feed_forward(x, w1, w2, w3, *, tm=None):
    """SwiGLU FFN: w2(silu(w1(x)) * w3(x)).

    x       : (batch, seq, dim)
    w1, w3  : (hidden, dim)  -- PyTorch nn.Linear (out_features, in_features)
    w2      : (dim, hidden)
    """
    batch, seq, dim = x.shape
    hidden = w1.shape[0]
    tokens = batch * seq
    itemsize = jnp.dtype(x.dtype).itemsize

    # Token tile: multiple of 16 so both f32 (8) and bf16 (16) sublane
    # packings are legal; capped at 256 (fills MXU rows on all generations).
    if tm is None:
        tm = min(256, _round_up(tokens, 16))
    padded_tokens = _round_up(tokens, tm)

    th = _pick_hidden_tile(hidden, dim, tm, itemsize)

    x2d = x.reshape(tokens, dim)
    if padded_tokens != tokens:
        x2d = jnp.pad(x2d, ((0, padded_tokens - tokens), (0, 0)))

    grid = (padded_tokens // tm, hidden // th)

    cost = pl.CostEstimate(
        flops=6 * tokens * dim * hidden,
        transcendentals=tokens * hidden,
        bytes_accessed=(x2d.size + w1.size + w2.size + w3.size
                        + tokens * dim) * itemsize,
    )

    out2d = pl.pallas_call(
        ffn_kernel,
        out_shape=jax.ShapeDtypeStruct((padded_tokens, dim), x.dtype),
        grid_spec=pltpu.PrefetchScalarGridSpec(
            num_scalar_prefetch=0,
            grid=grid,
            in_specs=[
                pl.BlockSpec((tm, dim), lambda i, h: (i, 0)),   # x
                pl.BlockSpec((th, dim), lambda i, h: (h, 0)),   # w1 (out, in)
                pl.BlockSpec((th, dim), lambda i, h: (h, 0)),   # w3 (out, in)
                pl.BlockSpec((dim, th), lambda i, h: (0, h)),   # w2 (out, in)
            ],
            out_specs=pl.BlockSpec((tm, dim), lambda i, h: (i, 0)),
            scratch_shapes=[pltpu.VMEM((tm, dim), jnp.float32)],
        ),
        compiler_params=pltpu.CompilerParams(
            dimension_semantics=("parallel", "arbitrary"),
            vmem_limit_bytes=56 * 1024 * 1024,
        ),
        cost_estimate=cost,
    )(x2d, w1, w3, w2)

    if padded_tokens != tokens:
        out2d = out2d[:tokens]
    return out2d.reshape(batch, seq, dim)


if __name__ == "__main__":
    # Small ModelArgs-consistent shapes: dim=32, hidden_dim=64, batch=2, seq=8.
    dim, hidden_dim = 32, 64
    batch, seq = 2, 8

    key = jax.random.PRNGKey(0)
    kx, k1, k2, k3 = jax.random.split(key, 4)

    x = jax.random.normal(kx, (batch, seq, dim), dtype=jnp.float32)
    # nn.Linear weight convention: (out_features, in_features)
    w1 = jax.random.normal(k1, (hidden_dim, dim), dtype=jnp.float32) * 0.05
    w2 = jax.random.normal(k2, (dim, hidden_dim), dtype=jnp.float32) * 0.05
    w3 = jax.random.normal(k3, (hidden_dim, dim), dtype=jnp.float32) * 0.05

    out = feed_forward(x, w1, w2, w3)
    out = jax.block_until_ready(out)

    # Pure-JAX reference (mirrors the PyTorch forward exactly).
    h1 = x @ w1.T
    ref = (h1 * jax.nn.sigmoid(h1) * (x @ w3.T)) @ w2.T
    assert out.shape == (batch, seq, dim)
    assert jnp.allclose(out, ref, atol=1e-5, rtol=1e-5), "mismatch vs reference"

    print("KERNEL_OK")
</pallas_src>

<mosaic_0001>
module attributes {stable_mosaic.version = 11 : i64} {
  func.func @ffn_kernel(%arg0: i32, %arg1: i32, %arg2: memref<16x32xf32, #tpu.memory_space<vmem>>, %arg3: memref<64x32xf32, #tpu.memory_space<vmem>>, %arg4: memref<64x32xf32, #tpu.memory_space<vmem>>, %arg5: memref<32x64xf32, #tpu.memory_space<vmem>>, %arg6: memref<16x32xf32, #tpu.memory_space<vmem>>, %arg7: memref<16x32xf32, #tpu.memory_space<vmem>>) attributes {dimension_semantics = [#tpu.dimension_semantics<parallel>, #tpu.dimension_semantics<arbitrary>], iteration_bounds = array<i64: 1, 1>, scalar_prefetch = 0 : i64, scratch_operands = 1 : i64, tpu.core_type = #tpu.core_type<tc>, window_params = [{transform_indices = @transform_0, window_bounds = array<i64: 16, 32>}, {transform_indices = @transform_1, window_bounds = array<i64: 64, 32>}, {transform_indices = @transform_2, window_bounds = array<i64: 64, 32>}, {transform_indices = @transform_3, window_bounds = array<i64: 32, 64>}, {transform_indices = @transform_4, window_bounds = array<i64: 16, 32>}]} {
    %c0_i32 = arith.constant 0 : i32
    %0 = arith.cmpi eq, %arg1, %c0_i32 : i32
    %1 = arith.extui %0 : i1 to i32
    %c0_i32_0 = arith.constant 0 : i32
    %2 = arith.cmpi ne, %1, %c0_i32_0 : i32
    scf.if %2 {
      %cst_17 = arith.constant 0.000000e+00 : f32
      %23 = vector.broadcast %cst_17 : f32 to vector<16x32xf32>
      %c0_18 = arith.constant 0 : index
      %c0_19 = arith.constant 0 : index
      %24 = vector.load %arg7[%c0_18, %c0_19] : memref<16x32xf32, #tpu.memory_space<vmem>>, vector<16x32xf32>
      tpu.vector_store %arg7[%c0_18, %c0_19], %23 {strides = array<i32>} : memref<16x32xf32, #tpu.memory_space<vmem>>, vector<16x32xf32>,
    } else {
    }
    %c0 = arith.constant 0 : index
    %c0_1 = arith.constant 0 : index
    %3 = vector.load %arg2[%c0, %c0_1] : memref<16x32xf32, #tpu.memory_space<vmem>>, vector<16x32xf32>
    %c0_2 = arith.constant 0 : index
    %c0_3 = arith.constant 0 : index
    %4 = vector.load %arg3[%c0_2, %c0_3] : memref<64x32xf32, #tpu.memory_space<vmem>>, vector<64x32xf32>
    %cst = arith.constant dense<0.000000e+00> : vector<16x64xf32>
    %5 = tpu.matmul %3, %4, %cst {dimension_numbers = #tpu.dot_dimension_numbers<[1], [1], [0], [0], [0, 0, 1, 0], [], []>} : vector<16x32xf32>, vector<64x32xf32>, vector<16x64xf32> -> vector<16x64xf32>
    %c0_4 = arith.constant 0 : index
    %c0_5 = arith.constant 0 : index
    %6 = vector.load %arg4[%c0_4, %c0_5] : memref<64x32xf32, #tpu.memory_space<vmem>>, vector<64x32xf32>
    %cst_6 = arith.constant dense<0.000000e+00> : vector<16x64xf32>
    %7 = tpu.matmul %3, %6, %cst_6 {dimension_numbers = #tpu.dot_dimension_numbers<[1], [1], [0], [0], [0, 0, 1, 0], [], []>} : vector<16x32xf32>, vector<64x32xf32>, vector<16x64xf32> -> vector<16x64xf32>
    %8 = arith.negf %5 : vector<16x64xf32>
    %9 = math.exp %8 : vector<16x64xf32>
    %cst_7 = arith.constant 1.000000e+00 : f32
    %10 = vector.broadcast %cst_7 : f32 to vector<16x64xf32>
    %11 = arith.addf %10, %9 : vector<16x64xf32>
    %12 = arith.divf %10, %11 : vector<16x64xf32>
    %13 = arith.mulf %5, %12 : vector<16x64xf32>
    %14 = arith.mulf %13, %7 : vector<16x64xf32>
    %c0_8 = arith.constant 0 : index
    %c0_9 = arith.constant 0 : index
    %15 = vector.load %arg7[%c0_8, %c0_9] : memref<16x32xf32, #tpu.memory_space<vmem>>, vector<16x32xf32>
    %c0_10 = arith.constant 0 : index
    %c0_11 = arith.constant 0 : index
    %16 = vector.load %arg5[%c0_10, %c0_11] : memref<32x64xf32, #tpu.memory_space<vmem>>, vector<32x64xf32>
    %cst_12 = arith.constant dense<0.000000e+00> : vector<16x32xf32>
    %17 = tpu.matmul %14, %16, %cst_12 {dimension_numbers = #tpu.dot_dimension_numbers<[1], [1], [0], [0], [0, 0, 1, 0], [], []>} : vector<16x64xf32>, vector<32x64xf32>, vector<16x32xf32> -> vector<16x32xf32>
    %18 = arith.addf %15, %17 : vector<16x32xf32>
    %c0_13 = arith.constant 0 : index
    %c0_14 = arith.constant 0 : index
    %19 = vector.load %arg7[%c0_13, %c0_14] : memref<16x32xf32, #tpu.memory_space<vmem>>, vector<16x32xf32>
    tpu.vector_store %arg7[%c0_13, %c0_14], %18 {strides = array<i32>} : memref<16x32xf32, #tpu.memory_space<vmem>>, vector<16x32xf32>,
    %c0_i32_15 = arith.constant 0 : i32
    %20 = arith.cmpi eq, %arg1, %c0_i32_15 : i32
    %21 = arith.extui %20 : i1 to i32
    %c0_i32_16 = arith.constant 0 : i32
    %22 = arith.cmpi ne, %21, %c0_i32_16 : i32
    scf.if %22 {
      %c0_17 = arith.constant 0 : index
      %c0_18 = arith.constant 0 : index
      %23 = vector.load %arg7[%c0_17, %c0_18] : memref<16x32xf32, #tpu.memory_space<vmem>>, vector<16x32xf32>
      %c0_19 = arith.constant 0 : index
      %c0_20 = arith.constant 0 : index
      %24 = vector.load %arg6[%c0_19, %c0_20] : memref<16x32xf32, #tpu.memory_space<vmem>>, vector<16x32xf32>
      tpu.vector_store %arg6[%c0_19, %c0_20], %23 {strides = array<i32>} : memref<16x32xf32, #tpu.memory_space<vmem>>, vector<16x32xf32>,
    } else {
    }
    return
  }
  func.func @transform_0(%arg0: i32, %arg1: i32) -> (i32, i32) {
    %c0_i32 = arith.constant 0 : i32
    %c0_i32_0 = arith.constant 0 : i32
    return %arg0, %c0_i32 : i32, i32
  }
  func.func @transform_1(%arg0: i32, %arg1: i32) -> (i32, i32) {
    %c0_i32 = arith.constant 0 : i32
    %c0_i32_0 = arith.constant 0 : i32
    return %arg1, %c0_i32 : i32, i32
  }
  func.func @transform_2(%arg0: i32, %arg1: i32) -> (i32, i32) {
    %c0_i32 = arith.constant 0 : i32
    %c0_i32_0 = arith.constant 0 : i32
    return %arg1, %c0_i32 : i32, i32
  }
  func.func @transform_3(%arg0: i32, %arg1: i32) -> (i32, i32) {
    %c0_i32 = arith.constant 0 : i32
    %c0_i32_0 = arith.constant 0 : i32
    return %c0_i32, %arg1 : i32, i32
  }
  func.func @transform_4(%arg0: i32, %arg1: i32) -> (i32, i32) {
    %c0_i32 = arith.constant 0 : i32
    %c0_i32_0 = arith.constant 0 : i32
    return %arg0, %c0_i32 : i32, i32
  }
}

</mosaic_0001>

<bundles_post_ra>
// kernel: tpu_custom_call.1
= control target key start
LH: loop header
LB: loop body
LE: loop exit
PB: predicated region body
PF: predicated region fallthrough
CT: control target
= control target key end

     0   :  { %vm22_vm0 = vcmask 261120   ;;  %s749_s0 = inlined_call_operand.vmem [shape: f32[16,32], index: 0, kind: input, shape index: {}]   ;;  %s750_s1 = inlined_call_operand.vmem [shape: f32[64,32], index: 1, kind: input, shape index: {}]   ;;  %s751_s2 = inlined_call_operand.vmem [shape: f32[64,32], index: 2, kind: input, shape index: {}]   ;;  %s752_s3 = inlined_call_operand.vmem [shape: f32[32,64], index: 3, kind: input, shape index: {}]   ;;  %s753_s4 = inlined_call_operand.hbm [shape: f32[16,32], index: 4, kind: output, shape index: {}]  }
   0x1   :  { %v27_v0 = vld [vmem:[%s750_s1] sm:$0xff]  ;;  %v28_v1 = vld [vmem:[%s750_s1 + $0x8] sm:$0xff]  ;;  %v29_v2 = vld [vmem:[%s750_s1 + $0x10] sm:$0xff] }
   0x2   :  { %v494_v3 = vpack.c.bf16 %v28_v1, %v27_v0  ;;  %vm630_vm1 = vmpackc.low %vm22_vm0, %vm22_vm0  ;;  %v30_v5 = vld [vmem:[%s750_s1 + $0x18] sm:$0xff]  ;;  %v141_v7 = vld [vmem:[%s751_s2] sm:$0xff] }
   0x3   :  { %v500_v6 = vpack.c.bf16 %v30_v5, %v29_v2  ;;  %v142_v8 = vld [vmem:[%s751_s2 + $0x8] sm:$0xff]  ;;  %v25_v9 = vld [vmem:[%s749_s0] sm:$0xff]  ;;  %v143_v11 = vld [vmem:[%s751_s2 + $0x10] sm:$0xff] }
   0x4   :  { %496 = vmatprep.subr.msk.bf16.mxu0 %vm630_vm1, %v494_v3  ;;  %v518_v10 = vpack.c.bf16 %v142_v8, %v141_v7  ;;  %461 = vmatprep.mubr.msk.f32.mxu0 %vm22_vm0, %v25_v9  ;;  %v144_v12 = vld [vmem:[%s751_s2 + $0x18] sm:$0xff]  ;;  %v31_v14 = vld [vmem:[%s750_s1 + $0x20] sm:$0xff]  ;;  %v32_v15 = vld [vmem:[%s750_s1 + $0x28] sm:$0xff] }
   0x5   :  { %499 = vmatpush3.bf16.xpose.msk.msra.mxu0 %vm630_vm1, %v494_v3  ;;  %v524_v13 = vpack.c.bf16 %v144_v12, %v143_v11  ;;  %480 = vmatprep.mubr.msk.f32.mxu1 %vm22_vm0, %v25_v9 }
   0x6   :  { %502 = vmatprep.subr.msk.bf16.mxu0 %vm630_vm1, %v500_v6  ;;  %520 = vmatprep.subr.msk.bf16.mxu1 %vm630_vm1, %v518_v10 }
   0x7   :  { %9 = vsyncpa [#allocation4], 0  ;;  %523 = vmatpush3.bf16.xpose.msk.msra.mxu1 %vm630_vm1, %v518_v10  ;;  %v506_v16 = vpack.c.bf16 %v32_v15, %v31_v14  ;;  %v145_v17 = vld [vmem:[%s751_s2 + $0x20] sm:$0xff]  ;;  %v146_v18 = vld [vmem:[%s751_s2 + $0x28] sm:$0xff]  ;;  %vm270_vm2 = vcmask 523264   ;;  %v590_v33 = vmov 0.0  }
   0x8   :  { %526 = vmatprep.subr.msk.bf16.mxu1 %vm630_vm1, %v524_v13  ;;  %v530_v19 = vpack.c.bf16 %v146_v18, %v145_v17  ;;  %v33_v20 = vld [vmem:[%s750_s1 + $0x30] sm:$0xff]  ;;  %v34_v21 = vld [vmem:[%s750_s1 + $0x38] sm:$0xff]  ;;  %v26_v26 = vld [vmem:[%s749_s0 + $0x8] sm:$0xff]  ;;  %24 = vst.msk [vmem:[#allocation2 + $0x8] sm:$0xff] %vm22_vm0, %v590_v33 }
   0x9   :  { %v512_v22 = vpack.c.bf16 %v34_v21, %v33_v20  ;;  %v147_v23 = vld [vmem:[%s751_s2 + $0x30] sm:$0xff]  ;;  %v148_v24 = vld [vmem:[%s751_s2 + $0x38] sm:$0xff]  ;;  %v266_v27 = vld [vmem:[%s752_s3] sm:$0xff]  ;;  %23 = vst.msk [vmem:[#allocation2] sm:$0xff] %vm22_vm0, %v590_v33 }
   0xa   :  { %v536_v25 = vpack.c.bf16 %v148_v24, %v147_v23  ;;  %v267_v28 = vld [vmem:[%s752_s3 + $0x8] sm:$0xff]  ;;  %vm543_vm3 = vmpackc.low %vm270_vm2, %vm270_vm2  ;;  %v268_v30 = vld [vmem:[%s752_s3 + $0x10] sm:$0xff] }
   0xb   :  { %v542_v29 = vpack.c.bf16 %v267_v28, %v266_v27  ;;  %v269_v31 = vld [vmem:[%s752_s3 + $0x18] sm:$0xff]  ;;  %s591_s3 = smov [#allocation3]  }
   0xc   :  { %v548_v32 = vpack.c.bf16 %v269_v31, %v268_v30  ;;  %s380_s30 = sshll.u32 %s591_s3, 4  ;;  %s381_s30 = int_to_ptr.vmem [resolvable:$true] %s380_s30 }
   0xd   :  { %505 = vmatpush3.bf16.xpose.msk.msra.mxu0 %vm630_vm1, %v500_v6  ;;  %s566_s5 = scalar_lea.vmem %s381_s30, 256  ;;  %p571_p1 = scmp.lt.s32.totalorder %s381_s30, %s381_s30 }
   0xe   :  { %508 = vmatprep.subr.msk.bf16.mxu0 %vm630_vm1, %v506_v16  ;;  %p567_p0 = scmp.ne.s32.totalorder %s381_s30, %s566_s5  ;;  %p572_p2 = scmp.lt.s32.totalorder %s566_s5, %s566_s5 }
   0xf   :  { %529 = vmatpush3.bf16.xpose.msk.msra.mxu1 %vm630_vm1, %v524_v13  ;;  %v265_v50 = vld [vmem:[#allocation2 + $0x8] sm:$0xff] }
  0x10   :  { %532 = vmatprep.subr.msk.bf16.mxu1 %vm630_vm1, %v530_v19  ;;  %v264_v51 = vld [vmem:[#allocation2] sm:$0xff]  ;;  %p573_p3 = por %p572_p2, %p571_p1 }
  0x12   :  { %p574_p4 = pnand %p573_p3, %p567_p0 }
  0x15   :  { %511 = vmatpush3.bf16.xpose.msk.msra.mxu0 %vm630_vm1, %v506_v16 }
  0x16   :  { %514 = vmatprep.subr.msk.bf16.mxu0 %vm630_vm1, %v512_v22 }
  0x17   :  { %535 = vmatpush3.bf16.xpose.msk.msra.mxu1 %vm630_vm1, %v530_v19 }
  0x18   :  { %538 = vmatprep.subr.msk.bf16.mxu1 %vm630_vm1, %v536_v25 }
  0x1d   :  { %517 = vmatpush3.bf16.xpose.msk.msra.mxu0 %vm630_vm1, %v512_v22 }
  0x1e   :  { %544 = vmatprep.subr.msk.bf16.mxu0 %vm543_vm3, %v542_v29 }
  0x1f   :  { %541 = vmatpush3.bf16.xpose.msk.msra.mxu1 %vm630_vm1, %v536_v25 }
  0x24   :  { %462 = vmatmul.mubr.msk.f32.vlgmr.msra.gmra.mrb[0].mxu0 %vm22_vm0, %v26_v26 }
  0x25   :  { %547 = vmatpush3.bf16.xpose.msk.msra.mxu0 %vm543_vm3, %v542_v29 }
  0x26   :  { %481 = vmatmul.mubr.msk.f32.vlgmr.msra.gmra.mrb[0].mxu1 %vm22_vm0, %v26_v26  ;;  %550 = vmatprep.subr.msk.bf16.mxu0 %vm543_vm3, %v548_v32 }
  0x2d   :  { %553 = vmatpush3.bf16.xpose.msk.msra.mxu0 %vm543_vm3, %v548_v32 }
  0xf7   :  { %v463_v34 = vpop.f32.mrb[0].mxu0 }
  0xf8   :  { %v412_v35 = vmul.f32 -1.442695, %v463_v34  ;;  %v132_v36 = vpop.f32.mrb[1].mxu0 }
  0xf9   :  { %v411_v37 = vmul.f32 -1.442695, %v132_v36  ;;  %v482_v38 = vpop.f32.mrb[0].mxu1 }
  0xfa   :  { %558 = vpow2.f32 %v412_v35  ;;  %v239_v39 = vpop.f32.mrb[1].mxu1 }
  0xfb   :  { %560 = vpow2.f32 %v411_v37 }
 0x104   :  { %v559_v40 = vpop.eup %558 }
 0x105   :  { %v561_v41 = vpop.eup %560  ;;  %v255_v42 = vadd.f32 1.0, %v559_v40 }
 0x106   :  { %v254_v43 = vadd.f32 1.0, %v561_v41 }
 0x107   :  { %562 = vrcp.f32 %v255_v42 }
 0x108   :  { %564 = vrcp.f32 %v254_v43 }
 0x111   :  { %v563_v44 = vpop.eup %562 }
 0x112   :  { %v565_v45 = vpop.eup %564  ;;  %v261_v46 = vmul.f32 %v563_v44, %v463_v34 }
 0x113   :  { %v260_v47 = vmul.f32 %v565_v45, %v132_v36 }
 0x114   :  { %v263_v48 = vmul.f32 %v482_v38, %v261_v46 }
 0x115   :  { %v262_v49 = vmul.f32 %v260_v47, %v239_v39 }
 0x117   :  { %491 = vmatprep.mubr.msk.f32.mxu0 %vm270_vm2, %v262_v49 }
 0x118   :  { %492 = vmatmul.mubr.msk.f32.vlgmr.msra.gmra.mrb[2].mxu0 %vm270_vm2, %v263_v48 }
 0x1eb   :  { %v493_v52 = vpop.f32.mrb[2].mxu0 }
 0x1ec   :  { %v365_v53 = vadd.f32 %v493_v52, %v265_v50  ;;  %v355_v54 = vpop.f32.mrb[3].mxu0 }
 0x1ed   :  { %v364_v55 = vadd.f32 %v355_v54, %v264_v51 }
 0x1ee   :  { %367 = vst.msk [vmem:[#allocation2 + $0x8] sm:$0xff] %vm22_vm0, %v365_v53 }
 0x1ef   :  { %366 = vst.msk [vmem:[#allocation2] sm:$0xff] %vm22_vm0, %v364_v55 }
 0x1f5   :  { %v372_v56 = vld [vmem:[#allocation2 + $0x8] sm:$0xff] }
 0x1f6   :  { %v371_v57 = vld [vmem:[#allocation2] sm:$0xff]  ;;  %374 = vst.msk [vmem:[#allocation3 + $0x8] sm:$0xff] %vm22_vm0, %v372_v56 }
 0x1f7   :  { %373 = vst.msk [vmem:[#allocation3] sm:$0xff] %vm22_vm0, %v371_v57 }
 0x1f8   :  { %577 = shalt.err (!%p574_p4)
}
 0x1f9   :  { %s578_s8 = scalar_lea.hbm %s753_s4, 256 }
 0x1fa   :  { %p579_p5 = scmp.ne.s32.totalorder %s753_s4, %s578_s8  ;;  %p582_p6 = scmp.lt.u32.totalorder %s578_s8, %s753_s4 }
 0x1fc   :  { %p584_p7 = pnand %p582_p6, %p579_p5 }
 0x1fe   :  { %587 = shalt.err (!%p584_p7)
}
 0x1ff   :  { %s592_s13 = smov 128   ;;  %s593_s14 = smov 8  }
 0x200   :  { %386 = dma.vmem_to_hbm [thread:$0]  %s381_s30, 256, %s753_s4, [#allocation4], %s592_s13, %s592_s13, %s593_s14  }
 0x201   :  { %588 = dma.done.wait [#allocation4], 256  }
 0x202   :  { %589 = vsyncadd [#allocation4], 4294967040 }
 0x203   :  { %390 = vsyncpa [#allocation4], 1 }

</bundles_post_ra>
